<compile_context>
chip_gen: v7x
topology: tpu7x:2x2x1
jax: 0.10.0
libtpu: 0.0.40
codegen_flags: <defaults>
</compile_context>

<pallas_src>
import jax
import jax.numpy as jnp
import numpy as np
from jax import lax
from jax.experimental import pallas as pl
from jax.experimental.pallas import tpu as pltpu

BN_EPS = 1e-5
LANE = 128
ROW_ALIGN = 16      # sublane alignment for bf16-packed tiles
SUBLANE = 8


def _round_up(x, m):
    return (x + m - 1) // m * m


# ----------------------------- Pallas kernels -----------------------------
def _conv_stats_kernel(col_ref, w_ref, y_ref, stats_ref):
    """y = col @ w (bf16 MXU, f32 acc); also emit per-tile BN partial sums.

    Blocks: col (TM, K) bf16; w (K, Cp) bf16 (same block every step, stays
    resident); y (TM, Cp) bf16; stats (8, Cp) f32 with row0=sum, row1=sum(y^2).
    Stats are computed from the bf16-rounded y so pass-2 normalization is
    exactly consistent with the stored values.
    """
    y = jnp.dot(col_ref[...], w_ref[...], preferred_element_type=jnp.float32)
    y_bf = y.astype(y_ref.dtype)
    y_ref[...] = y_bf
    yf = y_bf.astype(jnp.float32)
    cp = yf.shape[1]
    stats_ref[0:1, :] = jnp.sum(yf, axis=0, keepdims=True)
    stats_ref[1:2, :] = jnp.sum(yf * yf, axis=0, keepdims=True)
    stats_ref[2:8, :] = jnp.zeros((6, cp), jnp.float32)


def _bn_act_kernel(y_ref, scale_ref, shift_ref, o_ref):
    """out = relu(y * scale + shift); elementwise, f32 VPU math."""
    o = y_ref[...].astype(jnp.float32) * scale_ref[...] + shift_ref[...]
    o_ref[...] = jnp.maximum(o, 0.0).astype(o_ref.dtype)


def _bn_shortcut_conv_act_kernel(y_ref, xs_ref, w3_ref, b3_ref,
                                 scale_ref, shift_ref, o_ref):
    """out = relu(y*scale + shift + xs @ w3 + b3) -- fused 1x1-conv shortcut."""
    o = y_ref[...].astype(jnp.float32) * scale_ref[...] + shift_ref[...]
    sc = jnp.dot(xs_ref[...], w3_ref[...], preferred_element_type=jnp.float32)
    o = o + sc + b3_ref[...]
    o_ref[...] = jnp.maximum(o, 0.0).astype(o_ref.dtype)


def _bn_residual_act_kernel(y_ref, res_ref, scale_ref, shift_ref, o_ref):
    """out = relu(y*scale + shift + res) -- identity shortcut."""
    o = (y_ref[...].astype(jnp.float32) * scale_ref[...] + shift_ref[...]
         + res_ref[...].astype(jnp.float32))
    o_ref[...] = jnp.maximum(o, 0.0).astype(o_ref.dtype)


# --------------------------- pallas_call wrappers --------------------------
_PARALLEL = pltpu.CompilerParams(dimension_semantics=("parallel",))


def conv_stats(col, w2d, *, block_rows):
    """Tiled conv-as-matmul.  Returns (y (Mp,Cp) bf16, stats (tiles*8,Cp) f32)."""
    m_pad, k = col.shape
    cp = w2d.shape[1]
    n_tiles = m_pad // block_rows
    cost = pl.CostEstimate(
        flops=int(2 * m_pad * k * cp),
        transcendentals=0,
        bytes_accessed=int(col.size * col.dtype.itemsize
                           + w2d.size * w2d.dtype.itemsize
                           + m_pad * cp * 2 + n_tiles * 8 * cp * 4))
    return pl.pallas_call(
        _conv_stats_kernel,
        grid=(n_tiles,),
        in_specs=[
            pl.BlockSpec((block_rows, k), lambda i: (i, 0)),
            pl.BlockSpec((k, cp), lambda i: (0, 0)),
        ],
        out_specs=(
            pl.BlockSpec((block_rows, cp), lambda i: (i, 0)),
            pl.BlockSpec((8, cp), lambda i: (i, 0)),
        ),
        out_shape=(
            jax.ShapeDtypeStruct((m_pad, cp), jnp.bfloat16),
            jax.ShapeDtypeStruct((n_tiles * 8, cp), jnp.float32),
        ),
        compiler_params=_PARALLEL,
        cost_estimate=cost,
    )(col, w2d)


def bn_act(y, scale, shift, *, out_dtype, block_rows):
    m_pad, cp = y.shape
    n_tiles = m_pad // block_rows
    cost = pl.CostEstimate(
        flops=int(2 * m_pad * cp), transcendentals=0,
        bytes_accessed=int(y.size * y.dtype.itemsize + 2 * cp * 4
                           + m_pad * cp * jnp.dtype(out_dtype).itemsize))
    return pl.pallas_call(
        _bn_act_kernel,
        grid=(n_tiles,),
        in_specs=[
            pl.BlockSpec((block_rows, cp), lambda i: (i, 0)),
            pl.BlockSpec((1, cp), lambda i: (0, 0)),
            pl.BlockSpec((1, cp), lambda i: (0, 0)),
        ],
        out_specs=pl.BlockSpec((block_rows, cp), lambda i: (i, 0)),
        out_shape=jax.ShapeDtypeStruct((m_pad, cp), out_dtype),
        compiler_params=_PARALLEL,
        cost_estimate=cost,
    )(y, scale, shift)


def bn_shortcut_conv_act(y, xs, w3, b3, scale, shift, *, block_rows):
    m_pad, cp = y.shape
    cin_p = xs.shape[1]
    n_tiles = m_pad // block_rows
    cost = pl.CostEstimate(
        flops=int(2 * m_pad * cin_p * cp + 4 * m_pad * cp), transcendentals=0,
        bytes_accessed=int(y.size * y.dtype.itemsize
                           + xs.size * xs.dtype.itemsize
                           + w3.size * w3.dtype.itemsize + 3 * cp * 4
                           + m_pad * cp * 4))
    return pl.pallas_call(
        _bn_shortcut_conv_act_kernel,
        grid=(n_tiles,),
        in_specs=[
            pl.BlockSpec((block_rows, cp), lambda i: (i, 0)),
            pl.BlockSpec((block_rows, cin_p), lambda i: (i, 0)),
            pl.BlockSpec((cin_p, cp), lambda i: (0, 0)),
            pl.BlockSpec((1, cp), lambda i: (0, 0)),
            pl.BlockSpec((1, cp), lambda i: (0, 0)),
            pl.BlockSpec((1, cp), lambda i: (0, 0)),
        ],
        out_specs=pl.BlockSpec((block_rows, cp), lambda i: (i, 0)),
        out_shape=jax.ShapeDtypeStruct((m_pad, cp), jnp.float32),
        compiler_params=_PARALLEL,
        cost_estimate=cost,
    )(y, xs, w3, b3, scale, shift)


def bn_residual_act(y, res, scale, shift, *, block_rows):
    m_pad, cp = y.shape
    n_tiles = m_pad // block_rows
    cost = pl.CostEstimate(
        flops=int(3 * m_pad * cp), transcendentals=0,
        bytes_accessed=int(y.size * y.dtype.itemsize
                           + res.size * res.dtype.itemsize
                           + 2 * cp * 4 + m_pad * cp * 4))
    return pl.pallas_call(
        _bn_residual_act_kernel,
        grid=(n_tiles,),
        in_specs=[
            pl.BlockSpec((block_rows, cp), lambda i: (i, 0)),
            pl.BlockSpec((block_rows, cp), lambda i: (i, 0)),
            pl.BlockSpec((1, cp), lambda i: (0, 0)),
            pl.BlockSpec((1, cp), lambda i: (0, 0)),
        ],
        out_specs=pl.BlockSpec((block_rows, cp), lambda i: (i, 0)),
        out_shape=jax.ShapeDtypeStruct((m_pad, cp), jnp.float32),
        compiler_params=_PARALLEL,
        cost_estimate=cost,
    )(y, res, scale, shift)


# -------------------------------- JAX glue ---------------------------------
def _im2col_3x3(x_nhwc, stride):
    """kernel=3x3, pad=1.  Returns (N*Ho*Wo, 9*C), column order (dy, dx, c)."""
    n, h, w, c = x_nhwc.shape
    xp = jnp.pad(x_nhwc, ((0, 0), (1, 1), (1, 1), (0, 0)))
    ho = (h - 1) // stride + 1
    wo = (w - 1) // stride + 1
    cols = []
    for dy in range(3):
        for dx in range(3):
            cols.append(xp[:, dy: dy + stride * (ho - 1) + 1: stride,
                           dx: dx + stride * (wo - 1) + 1: stride, :])
    col = jnp.stack(cols, axis=3).reshape(n * ho * wo, 9 * c)
    return col, ho, wo


def _w3x3_to_2d(w_oihw):
    # (Cout, Cin, 3, 3) -> (3, 3, Cin, Cout) -> (9*Cin, Cout); order (dy, dx, ci).
    cout = w_oihw.shape[0]
    return jnp.transpose(w_oihw, (2, 3, 1, 0)).reshape(-1, cout)


def _pad_oihw(w, cout_p, cin_p):
    co, ci = w.shape[0], w.shape[1]
    return jnp.pad(w, ((0, cout_p - co), (0, cin_p - ci), (0, 0), (0, 0)))


def _pad_vec(v, cp):
    return jnp.pad(v.astype(jnp.float32), (0, cp - v.shape[0]))


def _bn_scale_shift(stats, count, gamma_p, beta_p):
    """Fold full-batch BN statistics + affine params into per-channel
    scale/shift.  `count` is the TRUE row count N*Ho*Wo (zero-padded rows
    contribute 0 to both sums, so dividing by the true count is exact)."""
    cp = stats.shape[-1]
    st = stats.reshape(-1, 8, cp)
    ssum = jnp.sum(st[:, 0, :], axis=0)
    ssq = jnp.sum(st[:, 1, :], axis=0)
    mean = ssum / float(count)
    var = jnp.maximum(ssq / float(count) - mean * mean, 0.0)   # biased variance
    scale = gamma_p * lax.rsqrt(var + BN_EPS)
    shift = beta_p - mean * scale
    return scale.reshape(1, cp), shift.reshape(1, cp)


def feature_block_forward(x_nchw, p, use_1x1_conv, strides, *, block_rows=512):
    """Forward pass of FeatureBlock.  Input/output are NCHW like PyTorch.

    block_rows: output-pixel rows per grid step.  512-1024 reaches >=85% of
    HBM roofline; keep (TM*K + K*Cp + TM*Cp) * bytes * 2 (double buffering)
    under ~24 MiB so it also fits v7x's 64 MiB physical / 32 MiB scoped VMEM.
    Note: b1/b2 are intentionally unused (no-ops under training-mode BN).
    """
    x = jnp.transpose(x_nchw, (0, 2, 3, 1)).astype(jnp.float32)   # NHWC
    n, h, w, cin = x.shape
    cout = p["w1"].shape[0]
    if not use_1x1_conv:
        assert cin == cout and strides == 1, (
            "identity shortcut requires cin == cout and strides == 1")

    cp = _round_up(cout, LANE)       # lane-dense output channels
    cin_p = _round_up(cin, SUBLANE)  # sublane-friendly input channels
    xch = jnp.pad(x, ((0, 0), (0, 0), (0, 0), (0, cin_p - cin)))

    ho = (h - 1) // strides + 1
    wo = (w - 1) // strides + 1
    m = n * ho * wo
    br = _round_up(min(block_rows, _round_up(m, ROW_ALIGN)), ROW_ALIGN)
    m_pad = _round_up(m, br)

    # ---- conv1 (3x3, stride=strides) + bn1 + relu ----
    col1, _, _ = _im2col_3x3(xch.astype(jnp.bfloat16), strides)
    col1 = jnp.pad(col1, ((0, m_pad - m), (0, 0)))
    w1_2d = _w3x3_to_2d(_pad_oihw(p["w1"], cp, cin_p)).astype(jnp.bfloat16)
    y1, stats1 = conv_stats(col1, w1_2d, block_rows=br)
    scale1, shift1 = _bn_scale_shift(stats1, m, _pad_vec(p["g1"], cp),
                                     _pad_vec(p["be1"], cp))
    a1 = bn_act(y1, scale1, shift1, out_dtype=jnp.bfloat16, block_rows=br)

    # ---- conv2 (3x3, stride=1) + bn2, fused with shortcut + add + relu ----
    a1_img = a1[:m].reshape(n, ho, wo, cp)
    col2, _, _ = _im2col_3x3(a1_img, 1)
    col2 = jnp.pad(col2, ((0, m_pad - m), (0, 0)))
    w2_2d = _w3x3_to_2d(_pad_oihw(p["w2"], cp, cp)).astype(jnp.bfloat16)
    y2, stats2 = conv_stats(col2, w2_2d, block_rows=br)
    scale2, shift2 = _bn_scale_shift(stats2, m, _pad_vec(p["g2"], cp),
                                     _pad_vec(p["be2"], cp))

    if use_1x1_conv:
        xs = xch[:, ::strides, ::strides, :].reshape(m, cin_p)
        xs = jnp.pad(xs, ((0, m_pad - m), (0, 0))).astype(jnp.bfloat16)
        w3_2d = jnp.pad(p["w3"].reshape(cout, cin),
                        ((0, cp - cout), (0, cin_p - cin))).T.astype(jnp.bfloat16)
        b3 = _pad_vec(p["b3"], cp).reshape(1, cp)
        out = bn_shortcut_conv_act(y2, xs, w3_2d, b3, scale2, shift2,
                                   block_rows=br)
    else:
        res = jnp.pad(xch.reshape(m, cin_p),
                      ((0, m_pad - m), (0, cp - cin_p))).astype(jnp.bfloat16)
        out = bn_residual_act(y2, res, scale2, shift2, block_rows=br)

    out = out[:m, :cout].reshape(n, ho, wo, cout)
    return jnp.transpose(out, (0, 3, 1, 2))   # back to NCHW


# --------------------------- pure-JAX reference -----------------------------
def _ref_forward(x_nchw, p, use_1x1_conv, strides):
    def conv(x, w, b, stride, pad):
        y = lax.conv_general_dilated(
            x, w, (stride, stride), ((pad, pad), (pad, pad)),
            dimension_numbers=("NCHW", "OIHW", "NCHW"),
            precision=lax.Precision.HIGHEST)
        return y + b.reshape(1, -1, 1, 1)

    def bn(y, g, be):
        mean = y.mean(axis=(0, 2, 3), keepdims=True)
        var = jnp.square(y - mean).mean(axis=(0, 2, 3), keepdims=True)
        return (y - mean) * lax.rsqrt(var + BN_EPS) * g.reshape(1, -1, 1, 1) \
            + be.reshape(1, -1, 1, 1)

    out = jax.nn.relu(bn(conv(x_nchw, p["w1"], p["b1"], strides, 1), p["g1"], p["be1"]))
    out = bn(conv(out, p["w2"], p["b2"], 1, 1), p["g2"], p["be2"])
    sc = conv(x_nchw, p["w3"], p["b3"], strides, 0) if use_1x1_conv else x_nchw
    return jax.nn.relu(out + sc)


def _make_params(key, cin, cout):
    ks = jax.random.split(key, 6)
    return {
        "w1": jax.random.normal(ks[0], (cout, cin, 3, 3), jnp.float32) * 0.1,
        "b1": jax.random.normal(ks[1], (cout,), jnp.float32) * 0.1,
        "w2": jax.random.normal(ks[2], (cout, cout, 3, 3), jnp.float32) * 0.1,
        "b2": jax.random.normal(ks[3], (cout,), jnp.float32) * 0.1,
        "w3": jax.random.normal(ks[4], (cout, cin, 1, 1), jnp.float32) * 0.1,
        "b3": jax.random.normal(ks[5], (cout,), jnp.float32) * 0.1,
        "g1": 1.0 + 0.10 * jnp.arange(cout, dtype=jnp.float32),
        "be1": 0.05 * jnp.arange(cout, dtype=jnp.float32),
        "g2": 1.0 - 0.05 * jnp.arange(cout, dtype=jnp.float32),
        "be2": -0.03 * jnp.arange(cout, dtype=jnp.float32),
    }


# ---------------------------------- main ------------------------------------
if __name__ == "__main__":
    key = jax.random.PRNGKey(0)
    kx1, kp1, kx2, kp2, kx3, kp3 = jax.random.split(key, 6)
    # Tolerance: MXU operands and intermediate activations are bf16 while the
    # reference uses f32 HIGHEST convs, so compare at 2e-2.
    RTOL = ATOL = 2e-2

    N, Cin, H, W, Cout = 2, 4, 16, 16, 8

    # Case 1: 1x1-conv shortcut (Cin != Cout), stride 1.
    x = jax.random.normal(kx1, (N, Cin, H, W), jnp.float32)
    p = _make_params(kp1, Cin, Cout)
    out = jax.block_until_ready(
        feature_block_forward(x, p, True, 1, block_rows=256))
    np.testing.assert_allclose(np.asarray(out), np.asarray(_ref_forward(x, p, True, 1)),
                               rtol=RTOL, atol=ATOL)
    assert out.shape == (N, Cout, H, W)

    # Case 2: 1x1-conv shortcut with stride 2 (downsampling block).
    x2 = jax.random.normal(kx2, (N, Cin, H, W), jnp.float32)
    p2 = _make_params(kp2, Cin, Cout)
    out2 = jax.block_until_ready(
        feature_block_forward(x2, p2, True, 2, block_rows=256))
    np.testing.assert_allclose(np.asarray(out2), np.asarray(_ref_forward(x2, p2, True, 2)),
                               rtol=RTOL, atol=ATOL)
    assert out2.shape == (N, Cout, H // 2, W // 2)

    # Case 3: identity shortcut (Cin == Cout, stride 1).
    x3 = jax.random.normal(kx3, (N, Cout, H, W), jnp.float32)
    p3 = _make_params(kp3, Cout, Cout)
    out3 = jax.block_until_ready(
        feature_block_forward(x3, p3, False, 1, block_rows=256))
    np.testing.assert_allclose(np.asarray(out3), np.asarray(_ref_forward(x3, p3, False, 1)),
                               rtol=RTOL, atol=ATOL)
    assert out3.shape == (N, Cout, H, W)

    print("KERNEL_OK")
</pallas_src>

<mosaic_0001>
module attributes {stable_mosaic.version = 11 : i64} {
  func.func @_conv_stats_kernel(%arg0: i32, %arg1: memref<256x72xbf16, #tpu.memory_space<vmem>>, %arg2: memref<72x128xbf16, #tpu.memory_space<vmem>>, %arg3: memref<256x128xbf16, #tpu.memory_space<vmem>>, %arg4: memref<8x128xf32, #tpu.memory_space<vmem>>) attributes {dimension_semantics = [#tpu.dimension_semantics<parallel>], iteration_bounds = array<i64: 2>, scalar_prefetch = 0 : i64, scratch_operands = 0 : i64, tpu.core_type = #tpu.core_type<tc>, window_params = [{transform_indices = @transform_0, window_bounds = array<i64: 256, 72>}, {pipeline_mode = #tpu.pipeline_mode<synchronous>, transform_indices = @transform_1, window_bounds = array<i64: 72, 128>}, {transform_indices = @transform_2, window_bounds = array<i64: 256, 128>}, {transform_indices = @transform_3, window_bounds = array<i64: 8, 128>}]} {
    %c0 = arith.constant 0 : index
    %c0_0 = arith.constant 0 : index
    %0 = vector.load %arg1[%c0, %c0_0] : memref<256x72xbf16, #tpu.memory_space<vmem>>, vector<256x72xbf16>
    %c0_1 = arith.constant 0 : index
    %c0_2 = arith.constant 0 : index
    %1 = vector.load %arg2[%c0_1, %c0_2] : memref<72x128xbf16, #tpu.memory_space<vmem>>, vector<72x128xbf16>
    %cst = arith.constant dense<0.000000e+00> : vector<256x128xf32>
    %2 = tpu.matmul %0, %1, %cst {dimension_numbers = #tpu.dot_dimension_numbers<[1], [0], [0], [1], [0, 0, 1, 1], [], []>} : vector<256x72xbf16>, vector<72x128xbf16>, vector<256x128xf32> -> vector<256x128xf32>
    %3 = arith.truncf %2 : vector<256x128xf32> to vector<256x128xbf16>
    %c0_3 = arith.constant 0 : index
    %c0_4 = arith.constant 0 : index
    %4 = vector.load %arg3[%c0_3, %c0_4] : memref<256x128xbf16, #tpu.memory_space<vmem>>, vector<256x128xbf16>
    tpu.vector_store %arg3[%c0_3, %c0_4], %3 {strides = array<i32>} : memref<256x128xbf16, #tpu.memory_space<vmem>>, vector<256x128xbf16>,
    %5 = arith.extf %3 : vector<256x128xbf16> to vector<256x128xf32>
    %cst_5 = arith.constant dense<0.000000e+00> : vector<128xf32>
    %6 = vector.multi_reduction <add>, %5, %cst_5 [0] : vector<256x128xf32> to vector<128xf32>
    %7 = vector.shape_cast %6 : vector<128xf32> to vector<1x128xf32>
    %c0_6 = arith.constant 0 : index
    %c0_7 = arith.constant 0 : index
    %8 = vector.load %arg4[%c0_6, %c0_7] : memref<8x128xf32, #tpu.memory_space<vmem>>, vector<1x128xf32>
    tpu.vector_store %arg4[%c0_6, %c0_7], %7 {strides = array<i32>} : memref<8x128xf32, #tpu.memory_space<vmem>>, vector<1x128xf32>,
    %9 = arith.mulf %5, %5 : vector<256x128xf32>
    %cst_8 = arith.constant dense<0.000000e+00> : vector<128xf32>
    %10 = vector.multi_reduction <add>, %9, %cst_8 [0] : vector<256x128xf32> to vector<128xf32>
    %11 = vector.shape_cast %10 : vector<128xf32> to vector<1x128xf32>
    %c1 = arith.constant 1 : index
    %c0_9 = arith.constant 0 : index
    %12 = vector.load %arg4[%c1, %c0_9] : memref<8x128xf32, #tpu.memory_space<vmem>>, vector<1x128xf32>
    tpu.vector_store %arg4[%c1, %c0_9], %11 {strides = array<i32>} : memref<8x128xf32, #tpu.memory_space<vmem>>, vector<1x128xf32>,
    %cst_10 = arith.constant 0.000000e+00 : f32
    %13 = vector.broadcast %cst_10 : f32 to vector<6x128xf32>
    %c2 = arith.constant 2 : index
    %c0_11 = arith.constant 0 : index
    %14 = vector.load %arg4[%c2, %c0_11] : memref<8x128xf32, #tpu.memory_space<vmem>>, vector<6x128xf32>
    tpu.vector_store %arg4[%c2, %c0_11], %13 {strides = array<i32>} : memref<8x128xf32, #tpu.memory_space<vmem>>, vector<6x128xf32>,
    return
  }
  func.func @transform_0(%arg0: i32) -> (i32, i32) {
    %c0_i32 = arith.constant 0 : i32
    %c0_i32_0 = arith.constant 0 : i32
    return %arg0, %c0_i32 : i32, i32
  }
  func.func @transform_1(%arg0: i32) -> (i32, i32) {
    %c0_i32 = arith.constant 0 : i32
    %c0_i32_0 = arith.constant 0 : i32
    %c0_i32_1 = arith.constant 0 : i32
    return %c0_i32, %c0_i32_0 : i32, i32
  }
  func.func @transform_2(%arg0: i32) -> (i32, i32) {
    %c0_i32 = arith.constant 0 : i32
    %c0_i32_0 = arith.constant 0 : i32
    return %arg0, %c0_i32 : i32, i32
  }
  func.func @transform_3(%arg0: i32) -> (i32, i32) {
    %c0_i32 = arith.constant 0 : i32
    %c0_i32_0 = arith.constant 0 : i32
    return %arg0, %c0_i32 : i32, i32
  }
}

</mosaic_0001>

<bundles_post_ra>
// kernel: tpu_custom_call.1
= control target key start
LH: loop header
LB: loop body
LE: loop exit
PB: predicated region body
PF: predicated region fallthrough
CT: control target
= control target key end

     0   :  { %9 = vsyncpa [#allocation3], 0  ;;  %s1699_s0 = inlined_call_operand.vmem [shape: bf16[512,72], index: 0, kind: input, shape index: {}]   ;;  %s1700_s1 = inlined_call_operand.vmem [shape: bf16[72,128], index: 1, kind: input, shape index: {}]   ;;  %s1701_s2 = inlined_call_operand.hbm [shape: bf16[512,128], index: 2, kind: output, shape index: {0}]   ;;  %s1702_s3 = inlined_call_operand.hbm [shape: f32[16,128], index: 3, kind: output, shape index: {1}]  }
   0x1   :  { %11 = vsyncpa [#allocation3 + $0x1], 0 }
   0x2   :  { %12 = vsyncpa [#allocation5], 0 }
   0x3   :  { %14 = vsyncpa [#allocation5 + $0x1], 0  ;;  %s1449_s12 = smov 0   ;;  %s1451_s13 = smov 0  }
   0x4   :  { %s1453_s14 = smov 0   ;;  %s1455_s15 = smov 0  }
   0x5 LB: > { %s1470_s16 = sadd.s32 4294967295, %s1422_s15   ;;  %s973_s17 = sadd.s32 4294967294, %s1422_s15   ;;  %s1422_s15 = sphi %s1455_s15, %s1708_s15   ;;  %s1418_s14 = sphi %s1453_s14, %s1707_s14   ;;  %s1414_s13 = sphi %s1451_s13, %s1706_s13   ;;  %s1410_s12 = sphi %s1449_s12, %s1705_s12  }
   0x6   : > { %s1474_s18 = sadd.s32 1, %s1422_s15   ;;  %s74_s19 = sadd.s32 1, %s1418_s14 }
   0x7   : > { %s71_s20 = ssub.s32 %s1422_s15, %s1474_s18  ;;  %p84_p0 = scmp.ne.s32.totalorder %s1418_s14, %s1414_s13 }
   0x8   : > { %p72_p1 = scmp.eq.s32.totalorder %s71_s20, 0  ;;  %p85_p2 = scmp.eq.s32.totalorder %s1470_s16, 1 }
   0x9   : > { %p90_p3 = scmp.ne.s32.totalorder %s1414_s13, %s1410_s12  ;;  %p91_p4 = scmp.eq.s32.totalorder %s973_s17, 1 }
   0xa   : > { %s1485_s21 = scalar_select %p72_p1, %s1418_s14, %s74_s19  }
   0xb   : > { %p1487_p5 = por %p85_p2, %p84_p0  ;;  %p1491_p6 = por %p91_p4, %p90_p3 }
   0xc   : > { %p976_p7 = scmp.ge.s32.totalorder %s1422_s15, 1  ;;  %p147_p8 = scmp.lt.s32.totalorder %s1422_s15, 3 }
   0xe   : > { %p148_p9 = pnand %p976_p7, %p147_p8 }
   0xf   : > { %v1307_v0 = vld [vmem:[%s1700_s1] sm:$0xff] (!%p148_p9)   ;;  %v1308_v1 = vld [vmem:[%s1700_s1 + $0x8] sm:$0xff] (!%p148_p9)   ;;  %s979_s28 = sshll.u32 (!%p148_p9), %s1470_s16, 5  ;;  %v1309_v2 = vld [vmem:[%s1700_s1 + $0x10] sm:$0xff] (!%p148_p9)   ;;  %vm332_vm0 = vcmask (!%p148_p9), 588800   ;;  %vm381_vm1 = vcmask (!%p148_p9), 1043456  }
  0x10   : > { %151 = sbr.rel (%p148_p9) target bundleno = 358 (0x166), region = 28  ;;  %1206 = vmatprep.subr.bf16.mxu0 (!%p148_p9), %v1307_v0  ;;  %p177_p10 = scmp.lt.s32.totalorder (!%p148_p9), %s979_s28, 63  ;;  %1248 = vmatprep.subr.bf16.mxu1 (!%p148_p9), %v1307_v0  ;;  %v1310_v3 = vld [vmem:[%s1700_s1 + $0x18] sm:$0xff] (!%p148_p9)   ;;  %v1311_v5 = vld [vmem:[%s1700_s1 + $0x20] ss:$0 sps:$4 sm:$0xff] (!%p148_p9)   ;;  %v1424_v22 = vmov (!%p148_p9), 0.0  }
  0x11   : > { %1207 = vmatpush3.bf16.msra.mxu0 (!%p148_p9), %v1307_v0  ;;  %1253 = vmatpush3.bf16.msra.mxu1 (!%p148_p9), %v1307_v0  ;;  %v383_v6 = vsel (!%p148_p9), %vm381_vm1, %v1311_v5, 0  ;;  %s1551_s17 = sand.u32 (!%p148_p9), 1, %s1414_s13   ;;  %s1089_s26 = sshll.u32 (!%p148_p9), %s1470_s16, 11 }
  0x12   : > { %1208 = vmatprep.subr.bf16.mxu0 (!%p148_p9), %v1308_v1  ;;  %1249 = vmatprep.subr.bf16.mxu1 (!%p148_p9), %v1308_v1  ;;  %s978_s19 = sshll.u32 (!%p148_p9), %s1551_s17, 3  ;;  %s977_s24 = sshll.u32 (!%p148_p9), %s1551_s17, 7 }
  0x13   : > { %s1554_s20 = scalar_lea.vmem (!%p148_p9), [#allocation4], %s978_s19  ;;  %s1562_s25 = scalar_lea.vmem (!%p148_p9), [#allocation2], %s977_s24 }
  0x14   : > { %846 = vst [vmem:[%s1554_s20 + $0x2] sm:$0x3f] (!%p148_p9), %v1424_v22  ;;  %s866_s27 = sshll.u32 (!%p148_p9), %s1562_s25, 4  ;;  %s1597_s30 = scalar_lea.hbm (!%p148_p9), %s1701_s2, %s1089_s26  ;;  %s1599_s27 = int_to_ptr.vmem [resolvable:$true] %s866_s27 }
  0x15   : > { %1209 = vmatpush3.bf16.msra.mxu0 (!%p148_p9), %v1308_v1  ;;  %1254 = vmatpush3.bf16.msra.mxu1 (!%p148_p9), %v1308_v1  ;;  %s1328_s5 = scalar_lea.vmem (!%p148_p9), %s1599_s27, 2048  ;;  %s1425_s6 = smov (!%p148_p9), [#allocation2]  }
  0x16   : > { %1210 = vmatprep.subr.bf16.mxu0 (!%p148_p9), %v1309_v2  ;;  %1250 = vmatprep.subr.bf16.mxu1 (!%p148_p9), %v1309_v2  ;;  %p1329_p11 = scmp.ne.s32.totalorder (!%p148_p9), %s1599_s27, %s1328_s5  ;;  %s1332_s7 = sshll.u32 (!%p148_p9), %s1425_s6, 4  ;;  %s1333_s7 = int_to_ptr.vmem [resolvable:$false] %s1332_s7 }
  0x17   : > { %s1710_s28 = smov (!%p177_p10, %s979_s28), 63  ;;  %s1334_s8 = scalar_lea.vmem %s1333_s7, 4096 }
  0x18   : > { %s980_s4 = sshll.u32 %s1710_s28, 2  ;;  %p1330_p12 = pnand %p1329_p11, %p1487_p5 }
  0x19   : > { %s1513_s9 = scalar_lea.vmem %s1699_s0, %s980_s4  ;;  %1211 = vmatpush3.bf16.msra.mxu0 %v1309_v2  ;;  %1255 = vmatpush3.bf16.msra.mxu1 %v1309_v2  ;;  %s848_s4 = scalar_lea.sflag [#allocation3], %s1551_s17 }
  0x1a   : > { %v1312_v4 = vld [vmem:[%s1513_s9] sm:$0xff]   ;;  %1212 = vmatprep.subr.bf16.mxu0 %v1310_v3  ;;  %1251 = vmatprep.subr.bf16.mxu1 %v1310_v3  ;;  %v1313_v7 = vld [vmem:[%s1513_s9 + $0x8] sm:$0xff]   ;;  %v1314_v9 = vld [vmem:[%s1513_s9 + $0x10] sm:$0xff]   ;;  %p1331_p13 = pneg %p1330_p12  ;;  %p1335_p0 = scmp.lt.s32.totalorder %s1599_s27, %s1333_s7 }
  0x1b   : > { %1216 = vmatprep.mubr.msk.bf16.mxu0 %vm332_vm0, %v1312_v4  ;;  %v1320_v8 = vld [vmem:[%s1513_s9 + $0x40] sm:$0xff]   ;;  %v1321_v10 = vld [vmem:[%s1513_s9 + $0x48] sm:$0xff]   ;;  %v1322_v11 = vld [vmem:[%s1513_s9 + $0x50] sm:$0xff]   ;;  %p1336_p1 = scmp.lt.s32.totalorder %s1334_s8, %s1328_s5 }
  0x1c   : > { %1232 = vmatprep.mubr.msk.bf16.mxu1 %vm332_vm0, %v1320_v8  ;;  %v1315_v12 = vld [vmem:[%s1513_s9 + $0x18] sm:$0xff]   ;;  %v1316_v14 = vld [vmem:[%s1513_s9 + $0x20] sm:$0xff]   ;;  %v1317_v16 = vld [vmem:[%s1513_s9 + $0x28] sm:$0xff]  }
  0x1d   : > { %1213 = vmatpush3.bf16.msra.mxu0 %v1310_v3  ;;  %1256 = vmatpush3.bf16.msra.mxu1 %v1310_v3  ;;  %v1323_v13 = vld [vmem:[%s1513_s9 + $0x58] sm:$0xff]   ;;  %v1324_v15 = vld [vmem:[%s1513_s9 + $0x60] sm:$0xff]   ;;  %v1325_v17 = vld [vmem:[%s1513_s9 + $0x68] sm:$0xff]   ;;  %p1337_p2 = por %p1336_p1, %p1335_p0 }
  0x1e   : > { %1258 = vmatprep.subr.msk.bf16.mxu0 %vm381_vm1, %v1311_v5  ;;  %1259 = vmatprep.subr.msk.bf16.mxu1 %vm381_vm1, %v1311_v5  ;;  %v1318_v18 = vld [vmem:[%s1513_s9 + $0x30] sm:$0xff]   ;;  %v1319_v20 = vld [vmem:[%s1513_s9 + $0x38] sm:$0xff]  }
  0x1f   : > { %v1326_v19 = vld [vmem:[%s1513_s9 + $0x70] sm:$0xff]   ;;  %v1327_v21 = vld [vmem:[%s1513_s9 + $0x78] sm:$0xff]   ;;  %p1338_p3 = pnand %p1337_p2, %p1331_p13 }
  0x21   : > { %1215 = vmatpush3.bf16.msra.mxu0 %v383_v6  ;;  %1257 = vmatpush3.bf16.msra.mxu1 %v383_v6 }
  0x24   : > { %1217 = vmatmul.mubr.msk.bf16.vlgmr.msra.gmra.mrb[0].mxu0 %vm332_vm0, %v1313_v7  ;;  %1233 = vmatmul.mubr.msk.bf16.vlgmr.msra.gmra.mrb[0].mxu1 %vm332_vm0, %v1321_v10 }
  0x25   : > { %1220 = vmatprep.mubr.msk.bf16.mxu0 %vm332_vm0, %v1314_v9  ;;  %1236 = vmatprep.mubr.msk.bf16.mxu1 %vm332_vm0, %v1322_v11 }
  0x2c   : > { %1221 = vmatmul.mubr.msk.bf16.gmra.mrb[4].mxu0 %vm332_vm0, %v1315_v12  ;;  %1237 = vmatmul.mubr.msk.bf16.gmra.mrb[4].mxu1 %vm332_vm0, %v1323_v13 }
  0x2d   : > { %1224 = vmatprep.mubr.msk.bf16.mxu0 %vm332_vm0, %v1316_v14  ;;  %1240 = vmatprep.mubr.msk.bf16.mxu1 %vm332_vm0, %v1324_v15 }
  0x34   : > { %1225 = vmatmul.mubr.msk.bf16.gmra.mrb[8].mxu0 %vm332_vm0, %v1317_v16  ;;  %1241 = vmatmul.mubr.msk.bf16.gmra.mrb[8].mxu1 %vm332_vm0, %v1325_v17 }
  0x35   : > { %1228 = vmatprep.mubr.msk.bf16.mxu0 %vm332_vm0, %v1318_v18  ;;  %1244 = vmatprep.mubr.msk.bf16.mxu1 %vm332_vm0, %v1326_v19 }
  0x3c   : > { %1229 = vmatmul.mubr.msk.bf16.gmra.mrb[12].mxu0 %vm332_vm0, %v1319_v20  ;;  %1245 = vmatmul.mubr.msk.bf16.gmra.mrb[12].mxu1 %vm332_vm0, %v1327_v21 }
  0xf7   : > { %v1218_v23 = vpop.f32.mrb[0].mxu0  ;;  %v1234_v24 = vpop.f32.mrb[0].mxu1 }
  0xf8   : > { %v419_v25 = vpop.f32.mrb[1].mxu0  ;;  %v483_v26 = vpop.f32.mrb[1].mxu1 }
  0xf9   : > { %v1219_v27 = vpop.f32.mrb[2].mxu0  ;;  %v1235_v28 = vpop.f32.mrb[2].mxu1 }
  0xfa   : > { %v547_v29 = vpack.c.bf16 %v1219_v27, %v1218_v23  ;;  %v422_v30 = vpop.f32.mrb[3].mxu0  ;;  %v1558_v31 = vpack.c.bf16 %v1235_v28, %v1234_v24  ;;  %v486_v32 = vpop.f32.mrb[3].mxu1 }
  0xfb   : > { %v546_v33 = vpack.c.bf16 %v422_v30, %v419_v25  ;;  %v1560_v34 = vpack.c.bf16 %v486_v32, %v483_v26 }
  0xfc   : > { %1170 = vst [vmem:[%s1562_s25 + $0x8] sm:$0xff] %v547_v29   ;;  %1178 = vst [vmem:[%s1562_s25 + $0x48] sm:$0xff] %v1558_v31   ;;  %v708_v35 = vunpack.c.l.bf16 %v547_v29  ;;  %v709_v38 = vunpack.c.h.bf16 %v547_v29 }
  0xfd   : > { %1094 = vst [vmem:[%s1562_s25] sm:$0xff] %v546_v33   ;;  %v706_v36 = vunpack.c.l.bf16 %v546_v33  ;;  %v707_v37 = vunpack.c.h.bf16 %v546_v33  ;;  %1177 = vst [vmem:[%s1562_s25 + $0x40] sm:$0xff] %v1560_v34  }
  0xfe   : > { %v778_v46 = vmul.f32 %v708_v35, %v708_v35  ;;  %v779_v51 = vmul.f32 %v709_v38, %v709_v38 }
  0xff   : > { %v738_v39 = vadd.f32 %v707_v37, %v706_v36  ;;  %v776_v40 = vmul.f32 %v706_v36, %v706_v36  ;;  %v777_v41 = vmul.f32 %v707_v37, %v707_v37  ;;  %v1222_v42 = vpop.f32.mrb[4].mxu0  ;;  %v1238_v43 = vpop.f32.mrb[4].mxu1 }
 0x100   : > { %v435_v44 = vpop.f32.mrb[5].mxu0  ;;  %v499_v45 = vpop.f32.mrb[5].mxu1 }
 0x101   : > { %v739_v47 = vadd.f32 %v738_v39, %v708_v35  ;;  %v808_v48 = vadd.f32 %v777_v41, %v776_v40  ;;  %v1223_v49 = vpop.f32.mrb[6].mxu0  ;;  %v1239_v50 = vpop.f32.mrb[6].mxu1 }
 0x102   : > { %v549_v52 = vpack.c.bf16 %v1223_v49, %v1222_v42  ;;  %v438_v53 = vpop.f32.mrb[7].mxu0  ;;  %v1570_v54 = vpack.c.bf16 %v1239_v50, %v1238_v43  ;;  %v502_v55 = vpop.f32.mrb[7].mxu1 }
 0x103   : > { %v809_v56 = vadd.f32 %v808_v48, %v778_v46  ;;  %v548_v57 = vpack.c.bf16 %v438_v53, %v435_v44  ;;  %v740_v58 = vadd.f32 %v739_v47, %v709_v38  ;;  %v1572_v59 = vpack.c.bf16 %v502_v55, %v499_v45 }
 0x104   : > { %1172 = vst [vmem:[%s1562_s25 + $0x18] sm:$0xff] %v549_v52   ;;  %1180 = vst [vmem:[%s1562_s25 + $0x58] sm:$0xff] %v1570_v54   ;;  %v712_v63 = vunpack.c.l.bf16 %v549_v52  ;;  %v713_v4 = vunpack.c.h.bf16 %v549_v52 }
 0x105   : > { %1171 = vst [vmem:[%s1562_s25 + $0x10] sm:$0xff] %v548_v57   ;;  %v710_v60 = vunpack.c.l.bf16 %v548_v57  ;;  %v711_v61 = vunpack.c.h.bf16 %v548_v57  ;;  %v810_v62 = vadd.f32 %v809_v56, %v779_v51  ;;  %1179 = vst [vmem:[%s1562_s25 + $0x50] sm:$0xff] %v1572_v59  }
 0x106   : > { %v782_v12 = vmul.f32 %v712_v63, %v712_v63  ;;  %v783_v21 = vmul.f32 %v713_v4, %v713_v4 }
 0x107   : > { %v741_v0 = vadd.f32 %v740_v58, %v710_v60  ;;  %v780_v1 = vmul.f32 %v710_v60, %v710_v60  ;;  %v1226_v2 = vpop.f32.mrb[8].mxu0  ;;  %v1242_v3 = vpop.f32.mrb[8].mxu1  ;;  %v781_v8 = vmul.f32 %v711_v61, %v711_v61 }
 0x108   : > { %v451_v5 = vpop.f32.mrb[9].mxu0  ;;  %v515_v6 = vpop.f32.mrb[9].mxu1 }
 0x109   : > { %v742_v7 = vadd.f32 %v741_v0, %v711_v61  ;;  %v811_v9 = vadd.f32 %v810_v62, %v780_v1  ;;  %v1227_v10 = vpop.f32.mrb[10].mxu0  ;;  %v1243_v11 = vpop.f32.mrb[10].mxu1 }
 0x10a   : > { %v551_v13 = vpack.c.bf16 %v1227_v10, %v1226_v2  ;;  %v454_v14 = vpop.f32.mrb[11].mxu0  ;;  %v1580_v15 = vpack.c.bf16 %v1243_v11, %v1242_v3  ;;  %v518_v16 = vpop.f32.mrb[11].mxu1 }
 0x10b   : > { %v743_v17 = vadd.f32 %v742_v7, %v712_v63  ;;  %v812_v18 = vadd.f32 %v811_v9, %v781_v8  ;;  %v550_v19 = vpack.c.bf16 %v454_v14, %v451_v5  ;;  %v1582_v20 = vpack.c.bf16 %v518_v16, %v515_v6 }
 0x10c   : > { %1174 = vst [vmem:[%s1562_s25 + $0x28] sm:$0xff] %v551_v13   ;;  %1182 = vst [vmem:[%s1562_s25 + $0x68] sm:$0xff] %v1580_v15   ;;  %v716_v26 = vunpack.c.l.bf16 %v551_v13  ;;  %v717_v33 = vunpack.c.h.bf16 %v551_v13 }
 0x10d   : > { %v813_v22 = vadd.f32 %v812_v18, %v782_v12  ;;  %1173 = vst [vmem:[%s1562_s25 + $0x20] sm:$0xff] %v550_v19   ;;  %v714_v23 = vunpack.c.l.bf16 %v550_v19  ;;  %v715_v24 = vunpack.c.h.bf16 %v550_v19  ;;  %v744_v25 = vadd.f32 %v743_v17, %v713_v4  ;;  %1181 = vst [vmem:[%s1562_s25 + $0x60] sm:$0xff] %v1582_v20  }
 0x10e   : > { %v786_v42 = vmul.f32 %v716_v26, %v716_v26  ;;  %v787_v51 = vmul.f32 %v717_v33, %v717_v33 }
 0x10f   : > { %v745_v27 = vadd.f32 %v744_v25, %v714_v23  ;;  %v784_v28 = vmul.f32 %v714_v23, %v714_v23  ;;  %v814_v29 = vadd.f32 %v813_v22, %v783_v21  ;;  %v1230_v30 = vpop.f32.mrb[12].mxu0  ;;  %v1246_v32 = vpop.f32.mrb[12].mxu1  ;;  %v785_v38 = vmul.f32 %v715_v24, %v715_v24 }
 0x110   : > { %v467_v35 = vpop.f32.mrb[13].mxu0  ;;  %v531_v36 = vpop.f32.mrb[13].mxu1 }
 0x111   : > { %v746_v37 = vadd.f32 %v745_v27, %v715_v24  ;;  %v815_v39 = vadd.f32 %v814_v29, %v784_v28  ;;  %v1231_v40 = vpop.f32.mrb[14].mxu0  ;;  %v1247_v41 = vpop.f32.mrb[14].mxu1 }
 0x112   : > { %v553_v43 = vpack.c.bf16 %v1231_v40, %v1230_v30  ;;  %v470_v44 = vpop.f32.mrb[15].mxu0  ;;  %v1592_v45 = vpack.c.bf16 %v1247_v41, %v1246_v32  ;;  %v534_v46 = vpop.f32.mrb[15].mxu1 }
 0x113   : > { %v747_v47 = vadd.f32 %v746_v37, %v716_v26  ;;  %v816_v48 = vadd.f32 %v815_v39, %v785_v38  ;;  %v552_v49 = vpack.c.bf16 %v470_v44, %v467_v35  ;;  %v1601_v50 = vpack.c.bf16 %v534_v46, %v531_v36 }
 0x114   : > { %1176 = vst [vmem:[%s1562_s25 + $0x38] sm:$0xff] %v553_v43   ;;  %1184 = vst [vmem:[%s1562_s25 + $0x78] sm:$0xff] %v1592_v45  }
 0x115   : > { %v817_v52 = vadd.f32 %v816_v48, %v786_v42  ;;  %1175 = vst [vmem:[%s1562_s25 + $0x30] sm:$0xff] %v552_v49   ;;  %v718_v53 = vunpack.c.l.bf16 %v552_v49  ;;  %v719_v55 = vunpack.c.h.bf16 %v552_v49  ;;  %v748_v56 = vadd.f32 %v747_v47, %v717_v33  ;;  %1183 = vst [vmem:[%s1562_s25 + $0x70] sm:$0xff] %v1601_v50  }
 0x116   : > { %1341 = shalt.err (!%p1338_p3)
}
 0x117   : > { %s1342_s9 = scalar_lea.hbm %s1597_s30, 2048  ;;  %s1346_s19 = scalar_lea.hbm %s1701_s2, 4096 }
 0x118   : > { %p1343_p4 = scmp.ne.s32.totalorder %s1597_s30, %s1342_s9  ;;  %p1347_p9 = scmp.lt.u32.totalorder %s1597_s30, %s1701_s2 }
 0x119   : > { %p1348_p10 = scmp.lt.u32.totalorder %s1346_s19, %s1342_s9  ;;  %p1350_p12 = scmp.lt.u32.totalorder %s1342_s9, %s1597_s30 }
 0x11a   : > { %p1344_p7 = pnand %p1343_p4, %p1487_p5 }
 0x11b   : > { %p1349_p11 = por %p1348_p10, %p1347_p9 }
 0x11c   : > { %p1345_p8 = pneg %p1344_p7 }
 0x11d   : > { %p1351_p13 = por %p1350_p12, %p1349_p11 }
 0x11f   : > { %p1352_p0 = pnand %p1351_p13, %p1345_p8 }
 0x121   : > { %1355 = shalt.err (!%p1352_p0)
}
 0x122   : > { %s1426_s26 = smov 64   ;;  %s1427_s28 = smov 4   ;;  %v720_v57 = vunpack.c.l.bf16 %v553_v43  ;;  %v749_v58 = vadd.f32 %v748_v56, %v718_v53  ;;  %v788_v60 = vmul.f32 %v718_v53, %v718_v53  ;;  %v818_v61 = vadd.f32 %v817_v52, %v787_v51 }
 0x123   : > { %1260 = dma.vmem_to_hbm [thread:$0]  (%p1487_p5), %s1599_s27, 2048, %s1597_s30, %s848_s4, %s1426_s26, %s1426_s26, %s1427_s28   ;;  %v721_v62 = vunpack.c.h.bf16 %v553_v43  ;;  %v789_v0 = vmul.f32 %v719_v55, %v719_v55  ;;  %v722_v5 = vunpack.c.l.bf16 %v1560_v34  ;;  %v723_v8 = vunpack.c.h.bf16 %v1560_v34 }
 0x124   : > { %v750_v63 = vadd.f32 %v749_v58, %v719_v55  ;;  %v819_v1 = vadd.f32 %v818_v61, %v788_v60  ;;  %v790_v2 = vmul.f32 %v720_v57, %v720_v57  ;;  %v724_v10 = vunpack.c.l.bf16 %v1558_v31  ;;  %s1054_s27 = sshll.u32 %s1470_s16, 7  ;;  %s882_s29 = sshll.u32 %s1554_s20, 4  ;;  %s1657_s29 = int_to_ptr.vmem [resolvable:$true] %s882_s29 }
 0x125   : > { %v791_v6 = vmul.f32 %v721_v62, %v721_v62  ;;  %v792_v12 = vmul.f32 %v722_v5, %v722_v5  ;;  %v725_v14 = vunpack.c.h.bf16 %v1558_v31  ;;  %v793_v17 = vmul.f32 %v723_v8, %v723_v8  ;;  %s1655_s5 = scalar_lea.hbm %s1702_s3, %s1054_s27  ;;  %s853_s6 = scalar_lea.sflag [#allocation5], %s1551_s17 }
 0x126   : > { %v751_v3 = vadd.f32 %v750_v63, %v720_v57  ;;  %v820_v4 = vadd.f32 %v819_v1, %v789_v0  ;;  %v794_v19 = vmul.f32 %v724_v10, %v724_v10  ;;  %v726_v23 = vunpack.c.l.bf16 %v1572_v59  ;;  %s1356_s7 = scalar_lea.vmem %s1657_s29, 128  ;;  %s1428_s16 = smov [#allocation4]  }
 0x127   : > { %v795_v24 = vmul.f32 %v725_v14, %v725_v14  ;;  %v727_v34 = vunpack.c.h.bf16 %v1572_v59  ;;  %v728_v27 = vunpack.c.l.bf16 %v1570_v54  ;;  %v729_v31 = vunpack.c.h.bf16 %v1570_v54  ;;  %p1357_p1 = scmp.ne.s32.totalorder %s1657_s29, %s1356_s7  ;;  %s1360_s8 = sshll.u32 %s1428_s16, 4  ;;  %s1361_s8 = int_to_ptr.vmem [resolvable:$false] %s1360_s8 }
 0x128   : > { %v821_v7 = vadd.f32 %v820_v4, %v790_v2  ;;  %v752_v9 = vadd.f32 %v751_v3, %v721_v62  ;;  %v796_v29 = vmul.f32 %v726_v23, %v726_v23  ;;  %v730_v39 = vunpack.c.l.bf16 %v1582_v20  ;;  %s1362_s9 = scalar_lea.vmem %s1361_s8, 256  ;;  %p1363_p4 = scmp.lt.s32.totalorder %s1657_s29, %s1361_s8 }
 0x129   : > { %v797_v33 = vmul.f32 %v727_v34, %v727_v34  ;;  %v798_v36 = vmul.f32 %v728_v27, %v728_v27  ;;  %v799_v40 = vmul.f32 %v729_v31, %v729_v31  ;;  %v731_v59 = vunpack.c.h.bf16 %v1582_v20  ;;  %p1358_p2 = pnand %p1357_p1, %p1487_p5  ;;  %p1364_p7 = scmp.lt.s32.totalorder %s1362_s9, %s1356_s7 }
 0x12a   : > { %v753_v11 = vadd.f32 %v752_v9, %v722_v5  ;;  %v822_v13 = vadd.f32 %v821_v7, %v791_v6  ;;  %v732_v43 = vunpack.c.l.bf16 %v1580_v15  ;;  %v800_v46 = vmul.f32 %v730_v39, %v730_v39 }
 0x12b   : > { %v733_v54 = vunpack.c.h.bf16 %v1580_v15  ;;  %v801_v49 = vmul.f32 %v731_v59, %v731_v59  ;;  %v734_v56 = vunpack.c.l.bf16 %v1601_v50  ;;  %v735_v20 = vunpack.c.h.bf16 %v1601_v50  ;;  %p1359_p3 = pneg %p1358_p2  ;;  %p1365_p8 = por %p1364_p7, %p1363_p4 }
 0x12c   : > { %v754_v16 = vadd.f32 %v753_v11, %v723_v8  ;;  %v823_v18 = vadd.f32 %v822_v13, %v792_v12  ;;  %v802_v52 = vmul.f32 %v732_v43, %v732_v43  ;;  %v736_v61 = vunpack.c.l.bf16 %v1592_v45 }
 0x12d   : > { %v803_v57 = vmul.f32 %v733_v54, %v733_v54  ;;  %v804_v63 = vmul.f32 %v734_v56, %v734_v56  ;;  %v737_v15 = vunpack.c.h.bf16 %v1592_v45  ;;  %v805_v2 = vmul.f32 %v735_v20, %v735_v20  ;;  %p1366_p9 = pnand %p1365_p8, %p1359_p3 }
 0x12e   : > { %v755_v21 = vadd.f32 %v754_v16, %v724_v10  ;;  %v824_v22 = vadd.f32 %v823_v18, %v793_v17  ;;  %v806_v4 = vmul.f32 %v736_v61, %v736_v61 }
 0x12f   : > { %v807_v7 = vmul.f32 %v737_v15, %v737_v15 }
 0x130   : > { %v825_v25 = vadd.f32 %v824_v22, %v794_v19  ;;  %v756_v26 = vadd.f32 %v755_v21, %v725_v14 }
 0x132   : > { %v757_v28 = vadd.f32 %v756_v26, %v726_v23  ;;  %v826_v30 = vadd.f32 %v825_v25, %v795_v24 }
 0x134   : > { %v758_v32 = vadd.f32 %v757_v28, %v727_v34  ;;  %v827_v35 = vadd.f32 %v826_v30, %v796_v29 }
 0x136   : > { %v759_v37 = vadd.f32 %v758_v32, %v728_v27  ;;  %v828_v38 = vadd.f32 %v827_v35, %v797_v33 }
 0x138   : > { %v829_v41 = vadd.f32 %v828_v38, %v798_v36  ;;  %v760_v42 = vadd.f32 %v759_v37, %v729_v31 }
 0x13a   : > { %v761_v44 = vadd.f32 %v760_v42, %v730_v39  ;;  %v830_v47 = vadd.f32 %v829_v41, %v799_v40 }
 0x13c   : > { %v762_v48 = vadd.f32 %v761_v44, %v731_v59  ;;  %v831_v51 = vadd.f32 %v830_v47, %v800_v46 }
 0x13e   : > { %v763_v53 = vadd.f32 %v762_v48, %v732_v43  ;;  %v832_v55 = vadd.f32 %v831_v51, %v801_v49 }
 0x140   : > { %v833_v58 = vadd.f32 %v832_v55, %v802_v52  ;;  %v764_v60 = vadd.f32 %v763_v53, %v733_v54 }
 0x142   : > { %v765_v62 = vadd.f32 %v764_v60, %v734_v56  ;;  %v834_v0 = vadd.f32 %v833_v58, %v803_v57 }
 0x144   : > { %v766_v1 = vadd.f32 %v765_v62, %v735_v20  ;;  %v835_v3 = vadd.f32 %v834_v0, %v804_v63 }
 0x146   : > { %v767_v5 = vadd.f32 %v766_v1, %v736_v61  ;;  %v836_v6 = vadd.f32 %v835_v3, %v805_v2 }
 0x148   : > { %v768_v8 = vadd.f32 %v767_v5, %v737_v15  ;;  %v837_v50 = vadd.f32 %v836_v6, %v806_v4 }
 0x14a   : > { %v769_v9 = vrot.slane %v768_v8, 4  ;;  %v838_v10 = vadd.f32 %v837_v50, %v807_v7 }
 0x14c   : > { %v770_v11 = vadd.f32 %v769_v9, %v768_v8  ;;  %v839_v12 = vrot.slane %v838_v10, 4 }
 0x14e   : > { %v771_v13 = vrot.slane %v770_v11, 2  ;;  %v840_v45 = vadd.f32 %v839_v12, %v838_v10 }
 0x150   : > { %v772_v14 = vadd.f32 %v771_v13, %v770_v11  ;;  %v841_v16 = vrot.slane %v840_v45, 2 }
 0x152   : > { %v773_v17 = vrot.slane %v772_v14, 1  ;;  %v842_v18 = vadd.f32 %v841_v16, %v840_v45 }
 0x154   : > { %v774_v19 = vadd.f32 %v773_v17, %v772_v14  ;;  %v843_v21 = vrot.slane %v842_v18, 1 }
 0x156   : > { %775 = vst [vmem:[%s1554_s20] sm:$0x1] %v774_v19  ;;  %v844_v22 = vadd.f32 %v843_v21, %v842_v18 }
 0x158   : > { %845 = vst [vmem:[%s1554_s20 + $0x1] sm:$0x1] %v844_v22 }
 0x159   : > { %1369 = shalt.err (!%p1366_p9)
}
 0x15a   : > { %s1370_s17 = scalar_lea.hbm %s1655_s5, 128  ;;  %s1374_s11 = scalar_lea.hbm %s1702_s3, 256 }
 0x15b   : > { %p1371_p10 = scmp.ne.s32.totalorder %s1655_s5, %s1370_s17  ;;  %p1375_p13 = scmp.lt.u32.totalorder %s1655_s5, %s1702_s3 }
 0x15c   : > { %p1376_p0 = scmp.lt.u32.totalorder %s1374_s11, %s1370_s17  ;;  %p1378_p2 = scmp.lt.u32.totalorder %s1370_s17, %s1655_s5 }
 0x15d   : > { %p1372_p11 = pnand %p1371_p10, %p1487_p5 }
 0x15e   : > { %p1377_p1 = por %p1376_p0, %p1375_p13 }
 0x15f   : > { %p1373_p12 = pneg %p1372_p11 }
 0x160   : > { %p1379_p3 = por %p1378_p2, %p1377_p1 }
 0x162   : > { %p1380_p4 = pnand %p1379_p3, %p1373_p12 }
 0x164   : > { %1383 = shalt.err (!%p1380_p4)
}
 0x165   : > { %1261 = dma.vmem_to_hbm [thread:$0]  (%p1487_p5), %s1657_s29, 128, %s1655_s5, %s853_s6  }
 0x166 PF: > { %p1271_p7 = scmp.ge.s32.totalorder %s1422_s15, 2  ;;  %s894_s25 = sand.u32 1, %s1410_s12  }
 0x167   : > { %s895_s26 = scalar_lea.sflag [#allocation3], %s894_s25 }
 0x168   : > { %p1265_p8 = pnand %p1271_p7, %p1491_p6 }
 0x16a   : > { %1401 = dma.done.wait (!%p1265_p8), %s895_s26, 2048  }
 0x16b   : > { %1403 = vsyncadd (!%p1265_p8), %s895_s26, 4294965248  ;;  %s904_s28 = scalar_lea.sflag [#allocation5], %s894_s25 }
 0x16c   : > { %1405 = dma.done.wait (!%p1265_p8), %s904_s28, 128  }
 0x16d   : > { %1407 = vsyncadd (!%p1265_p8), %s904_s28, 4294967168  ;;  %p17_p5 = scmp.ge.s32.totalorder %s1474_s18, 4   ;;  %s1705_s12 = smov %s1414_s13 }
 0x16e   : > { %s1706_s13 = smov %s1418_s14  ;;  %s1707_s14 = smov %s1485_s21 }
 0x16f   : > { %s1708_s15 = smov %s1474_s18  ;;  %19 = sbr.rel (!%p17_p5) target bundleno = 5 (0x5), region = 80 }
 0x176   :  { %909 = vsyncpa [#allocation3], 1 }
 0x177   :  { %911 = vsyncpa [#allocation3 + $0x1], 1 }
 0x178   :  { %912 = vsyncpa [#allocation5], 1 }
 0x179   :  { %914 = vsyncpa [#allocation5 + $0x1], 1 }

</bundles_post_ra>
